<compile_context>
chip_gen: v7x
topology: tpu7x:2x2x1
jax: 0.10.0
libtpu: 0.0.40
codegen_flags: <defaults>
</compile_context>

<pallas_src>
import jax
import jax.numpy as jnp
from jax.experimental import pallas as pl
from jax.experimental.pallas import tpu as pltpu


LN_EPS = 1e-5  # nn.LayerNorm default


def _round_up(v, m):
    return (v + m - 1) // m * m


def _mlp_kernel(x_ref, w1_ref, b1_ref, w2_ref, b2_ref, g_ref, beta_ref,
                w3_ref, b3_ref, o_ref):
    # Linear 1 + ReLU  (bf16 MXU matmul, f32 accumulation)
    h1 = jnp.dot(x_ref[...], w1_ref[...],
                 preferred_element_type=jnp.float32) + b1_ref[...]
    h1 = jnp.maximum(h1, 0.0).astype(w2_ref.dtype)

    # Linear 2 (f32 accumulation)
    h2 = jnp.dot(h1, w2_ref[...],
                 preferred_element_type=jnp.float32) + b2_ref[...]

    # LayerNorm over the FULL hidden axis (hidden is never tiled/padded, so
    # mean/var divide by the true hidden size), eps=1e-5, affine, all in f32.
    mean = jnp.mean(h2, axis=-1, keepdims=True)
    centered = h2 - mean
    var = jnp.mean(centered * centered, axis=-1, keepdims=True)
    h2n = centered * jax.lax.rsqrt(var + LN_EPS)   # rsqrt -> EUP slot
    h2n = h2n * g_ref[...] + beta_ref[...]

    # ReLU + Linear 3 (output features pre-padded to a multiple of 128 lanes)
    h3 = jnp.maximum(h2n, 0.0).astype(w3_ref.dtype)
    out = jnp.dot(h3, w3_ref[...],
                  preferred_element_type=jnp.float32) + b3_ref[...]
    o_ref[...] = out.astype(o_ref.dtype)


def mlp_two_layers_norm(x, params, *, block_rows=512,
                        compute_dtype=jnp.bfloat16):
    """x: (B, input_size) f32.  params: dict from init_params (f32)."""
    B, d_in = x.shape
    hidden = params["w1"].shape[1]
    out_size = params["w3"].shape[1]
    itemsize = jnp.dtype(compute_dtype).itemsize

    # ---- lane-dense output: pad output features up to a multiple of 128 ----
    out_pad = _round_up(max(out_size, 128), 128)
    w3 = params["w3"].astype(compute_dtype)
    b3 = params["b3"]
    if out_pad != out_size:
        w3 = jnp.pad(w3, ((0, 0), (0, out_pad - out_size)))
        b3 = jnp.pad(b3, ((0, 0), (0, out_pad - out_size)))

    # ---- batch tiling: TB rows per grid step (multiple of 8 sublanes) ----
    TB = _round_up(min(block_rows, max(B, 8)), 8)
    Bp = _round_up(B, TB)
    xq = x.astype(compute_dtype)
    if Bp != B:
        xq = jnp.pad(xq, ((0, Bp - B), (0, 0)))
    grid = (Bp // TB,)

    # bf16 weights for the MXU; biases / LN affine stay f32.
    w1 = params["w1"].astype(compute_dtype)
    w2 = params["w2"].astype(compute_dtype)

    # ---- VMEM budget (resident weights + double-buffered tiles + working set)
    bytes_weights = (d_in * hidden + hidden * hidden + hidden * out_pad) * itemsize
    bytes_small = (3 * hidden + out_pad) * 4
    bytes_tiles = 2 * (TB * d_in * itemsize + TB * out_pad * 4)   # double-buffered
    bytes_work = 3 * TB * hidden * 4                              # h1/h2/h3 f32
    est = bytes_weights + bytes_small + bytes_tiles + bytes_work
    vmem_limit = int(min(128 * 1024 * 1024, max(32 * 1024 * 1024, 1.5 * est)))
    # TODO(synk): for hidden sizes where f32/bf16 w2 alone exceeds v7x VMEM
    # (~64 MiB), add a K-tiled ("arbitrary") accumulator path for Linear1/2.

    row_spec = lambda shape: pl.BlockSpec(shape, lambda i: (i, 0))
    res_spec = lambda shape: pl.BlockSpec(shape, lambda i: (0, 0))  # weight-resident

    y = pl.pallas_call(
        _mlp_kernel,
        out_shape=jax.ShapeDtypeStruct((Bp, out_pad), jnp.float32),
        grid=grid,
        in_specs=[
            row_spec((TB, d_in)),                 # x tile (pipelined)
            res_spec((d_in, hidden)),             # w1
            res_spec((1, hidden)),                # b1
            res_spec((hidden, hidden)),           # w2
            res_spec((1, hidden)),                # b2
            res_spec((1, hidden)),                # ln gamma
            res_spec((1, hidden)),                # ln beta
            res_spec((hidden, out_pad)),          # w3 (padded)
            res_spec((1, out_pad)),               # b3 (padded)
        ],
        out_specs=row_spec((TB, out_pad)),
        compiler_params=pltpu.CompilerParams(
            dimension_semantics=("parallel",),
            vmem_limit_bytes=vmem_limit,
        ),
    )(xq, w1, params["b1"], w2, params["b2"],
      params["ln_g"], params["ln_b"], w3, b3)

    return y[:B, :out_size]


def init_params(key, input_size, hidden_size, output_size):
    """Deterministic PyTorch-style (uniform +/- 1/sqrt(fan_in)) init, f32."""
    ks = jax.random.split(key, 6)

    def lin(kw, kb, fan_in, fan_out):
        bound = 1.0 / jnp.sqrt(fan_in)
        w = jax.random.uniform(kw, (fan_in, fan_out), jnp.float32, -bound, bound)
        b = jax.random.uniform(kb, (1, fan_out), jnp.float32, -bound, bound)
        return w, b

    w1, b1 = lin(ks[0], ks[1], input_size, hidden_size)
    w2, b2 = lin(ks[2], ks[3], hidden_size, hidden_size)
    w3, b3 = lin(ks[4], ks[5], hidden_size, output_size)
    return {
        "w1": w1, "b1": b1,
        "w2": w2, "b2": b2,
        "ln_g": jnp.ones((1, hidden_size), jnp.float32),
        "ln_b": jnp.zeros((1, hidden_size), jnp.float32),
        "w3": w3, "b3": b3,
    }


def _reference(x, p):
    """Pure-f32 reference of the PyTorch module."""
    h1 = jnp.maximum(x @ p["w1"] + p["b1"], 0.0)
    h2 = h1 @ p["w2"] + p["b2"]
    mean = jnp.mean(h2, axis=-1, keepdims=True)
    var = jnp.mean((h2 - mean) ** 2, axis=-1, keepdims=True)
    h2n = (h2 - mean) / jnp.sqrt(var + LN_EPS) * p["ln_g"] + p["ln_b"]
    return jnp.maximum(h2n, 0.0) @ p["w3"] + p["b3"]


if __name__ == "__main__":
    batch, input_size, hidden_size, output_size = 8, 32, 64, 16

    key = jax.random.PRNGKey(0)
    k_x, k_p = jax.random.split(key)
    x = jax.random.normal(k_x, (batch, input_size), jnp.float32)
    params = init_params(k_p, input_size, hidden_size, output_size)

    y = jax.block_until_ready(mlp_two_layers_norm(x, params))
    y_ref = _reference(x, params)

    assert y.shape == (batch, output_size)
    # bf16 weights/activations inside the kernel -> compare with a loose tol.
    assert jnp.allclose(y, y_ref, atol=5e-2, rtol=5e-2), "mismatch vs reference"
    print("KERNEL_OK")
</pallas_src>

<mosaic_0001>
module attributes {stable_mosaic.version = 11 : i64} {
  func.func @_mlp_kernel(%arg0: i32, %arg1: memref<8x32xbf16, #tpu.memory_space<vmem>>, %arg2: memref<32x64xbf16, #tpu.memory_space<vmem>>, %arg3: memref<1x64xf32, #tpu.memory_space<vmem>>, %arg4: memref<64x64xbf16, #tpu.memory_space<vmem>>, %arg5: memref<1x64xf32, #tpu.memory_space<vmem>>, %arg6: memref<1x64xf32, #tpu.memory_space<vmem>>, %arg7: memref<1x64xf32, #tpu.memory_space<vmem>>, %arg8: memref<64x128xbf16, #tpu.memory_space<vmem>>, %arg9: memref<1x128xf32, #tpu.memory_space<vmem>>, %arg10: memref<8x128xf32, #tpu.memory_space<vmem>>) attributes {dimension_semantics = [#tpu.dimension_semantics<parallel>], iteration_bounds = array<i64: 1>, scalar_prefetch = 0 : i64, scratch_operands = 0 : i64, tpu.core_type = #tpu.core_type<tc>, window_params = [{transform_indices = @transform_0, window_bounds = array<i64: 8, 32>}, {pipeline_mode = #tpu.pipeline_mode<synchronous>, transform_indices = @transform_1, window_bounds = array<i64: 32, 64>}, {pipeline_mode = #tpu.pipeline_mode<synchronous>, transform_indices = @transform_2, window_bounds = array<i64: 1, 64>}, {pipeline_mode = #tpu.pipeline_mode<synchronous>, transform_indices = @transform_3, window_bounds = array<i64: 64, 64>}, {pipeline_mode = #tpu.pipeline_mode<synchronous>, transform_indices = @transform_4, window_bounds = array<i64: 1, 64>}, {pipeline_mode = #tpu.pipeline_mode<synchronous>, transform_indices = @transform_5, window_bounds = array<i64: 1, 64>}, {pipeline_mode = #tpu.pipeline_mode<synchronous>, transform_indices = @transform_6, window_bounds = array<i64: 1, 64>}, {pipeline_mode = #tpu.pipeline_mode<synchronous>, transform_indices = @transform_7, window_bounds = array<i64: 64, 128>}, {pipeline_mode = #tpu.pipeline_mode<synchronous>, transform_indices = @transform_8, window_bounds = array<i64: 1, 128>}, {transform_indices = @transform_9, window_bounds = array<i64: 8, 128>}]} {
    %c0 = arith.constant 0 : index
    %c0_0 = arith.constant 0 : index
    %0 = vector.load %arg1[%c0, %c0_0] : memref<8x32xbf16, #tpu.memory_space<vmem>>, vector<8x32xbf16>
    %c0_1 = arith.constant 0 : index
    %c0_2 = arith.constant 0 : index
    %1 = vector.load %arg2[%c0_1, %c0_2] : memref<32x64xbf16, #tpu.memory_space<vmem>>, vector<32x64xbf16>
    %cst = arith.constant dense<0.000000e+00> : vector<8x64xf32>
    %2 = tpu.matmul %0, %1, %cst {dimension_numbers = #tpu.dot_dimension_numbers<[1], [0], [0], [1], [0, 0, 1, 1], [], []>} : vector<8x32xbf16>, vector<32x64xbf16>, vector<8x64xf32> -> vector<8x64xf32>
    %c0_3 = arith.constant 0 : index
    %c0_4 = arith.constant 0 : index
    %3 = vector.load %arg3[%c0_3, %c0_4] : memref<1x64xf32, #tpu.memory_space<vmem>>, vector<1x64xf32>
    %4 = vector.broadcast %3 : vector<1x64xf32> to vector<8x64xf32>
    %5 = arith.addf %2, %4 : vector<8x64xf32>
    %cst_5 = arith.constant 0.000000e+00 : f32
    %6 = vector.broadcast %cst_5 : f32 to vector<8x64xf32>
    %7 = arith.maximumf %5, %6 : vector<8x64xf32>
    %8 = arith.truncf %7 : vector<8x64xf32> to vector<8x64xbf16>
    %c0_6 = arith.constant 0 : index
    %c0_7 = arith.constant 0 : index
    %9 = vector.load %arg4[%c0_6, %c0_7] : memref<64x64xbf16, #tpu.memory_space<vmem>>, vector<64x64xbf16>
    %cst_8 = arith.constant dense<0.000000e+00> : vector<8x64xf32>
    %10 = tpu.matmul %8, %9, %cst_8 {dimension_numbers = #tpu.dot_dimension_numbers<[1], [0], [0], [1], [0, 0, 1, 1], [], []>} : vector<8x64xbf16>, vector<64x64xbf16>, vector<8x64xf32> -> vector<8x64xf32>
    %c0_9 = arith.constant 0 : index
    %c0_10 = arith.constant 0 : index
    %11 = vector.load %arg5[%c0_9, %c0_10] : memref<1x64xf32, #tpu.memory_space<vmem>>, vector<1x64xf32>
    %12 = vector.broadcast %11 : vector<1x64xf32> to vector<8x64xf32>
    %13 = arith.addf %10, %12 : vector<8x64xf32>
    %cst_11 = arith.constant dense<0.000000e+00> : vector<8xf32>
    %14 = vector.multi_reduction <add>, %13, %cst_11 [1] : vector<8x64xf32> to vector<8xf32>
    %15 = vector.shape_cast %14 : vector<8xf32> to vector<8x1xf32>
    %cst_12 = arith.constant 6.400000e+01 : f32
    %16 = vector.broadcast %cst_12 : f32 to vector<8x1xf32>
    %17 = arith.divf %15, %16 : vector<8x1xf32>
    %18 = vector.broadcast %17 : vector<8x1xf32> to vector<8x64xf32>
    %19 = arith.subf %13, %18 : vector<8x64xf32>
    %20 = arith.mulf %19, %19 : vector<8x64xf32>
    %cst_13 = arith.constant dense<0.000000e+00> : vector<8xf32>
    %21 = vector.multi_reduction <add>, %20, %cst_13 [1] : vector<8x64xf32> to vector<8xf32>
    %22 = vector.shape_cast %21 : vector<8xf32> to vector<8x1xf32>
    %cst_14 = arith.constant 6.400000e+01 : f32
    %23 = vector.broadcast %cst_14 : f32 to vector<8x1xf32>
    %24 = arith.divf %22, %23 : vector<8x1xf32>
    %cst_15 = arith.constant 9.99999974E-6 : f32
    %25 = vector.broadcast %cst_15 : f32 to vector<8x1xf32>
    %26 = arith.addf %24, %25 : vector<8x1xf32>
    %27 = math.rsqrt %26 : vector<8x1xf32>
    %28 = vector.broadcast %27 : vector<8x1xf32> to vector<8x64xf32>
    %29 = arith.mulf %19, %28 : vector<8x64xf32>
    %c0_16 = arith.constant 0 : index
    %c0_17 = arith.constant 0 : index
    %30 = vector.load %arg6[%c0_16, %c0_17] : memref<1x64xf32, #tpu.memory_space<vmem>>, vector<1x64xf32>
    %31 = vector.broadcast %30 : vector<1x64xf32> to vector<8x64xf32>
    %32 = arith.mulf %29, %31 : vector<8x64xf32>
    %c0_18 = arith.constant 0 : index
    %c0_19 = arith.constant 0 : index
    %33 = vector.load %arg7[%c0_18, %c0_19] : memref<1x64xf32, #tpu.memory_space<vmem>>, vector<1x64xf32>
    %34 = vector.broadcast %33 : vector<1x64xf32> to vector<8x64xf32>
    %35 = arith.addf %32, %34 : vector<8x64xf32>
    %cst_20 = arith.constant 0.000000e+00 : f32
    %36 = vector.broadcast %cst_20 : f32 to vector<8x64xf32>
    %37 = arith.maximumf %35, %36 : vector<8x64xf32>
    %38 = arith.truncf %37 : vector<8x64xf32> to vector<8x64xbf16>
    %c0_21 = arith.constant 0 : index
    %c0_22 = arith.constant 0 : index
    %39 = vector.load %arg8[%c0_21, %c0_22] : memref<64x128xbf16, #tpu.memory_space<vmem>>, vector<64x128xbf16>
    %cst_23 = arith.constant dense<0.000000e+00> : vector<8x128xf32>
    %40 = tpu.matmul %38, %39, %cst_23 {dimension_numbers = #tpu.dot_dimension_numbers<[1], [0], [0], [1], [0, 0, 1, 1], [], []>} : vector<8x64xbf16>, vector<64x128xbf16>, vector<8x128xf32> -> vector<8x128xf32>
    %c0_24 = arith.constant 0 : index
    %c0_25 = arith.constant 0 : index
    %41 = vector.load %arg9[%c0_24, %c0_25] : memref<1x128xf32, #tpu.memory_space<vmem>>, vector<1x128xf32>
    %42 = vector.broadcast %41 : vector<1x128xf32> to vector<8x128xf32>
    %43 = arith.addf %40, %42 : vector<8x128xf32>
    %c0_26 = arith.constant 0 : index
    %c0_27 = arith.constant 0 : index
    %44 = vector.load %arg10[%c0_26, %c0_27] : memref<8x128xf32, #tpu.memory_space<vmem>>, vector<8x128xf32>
    tpu.vector_store %arg10[%c0_26, %c0_27], %43 {strides = array<i32>} : memref<8x128xf32, #tpu.memory_space<vmem>>, vector<8x128xf32>,
    return
  }
  func.func @transform_0(%arg0: i32) -> (i32, i32) {
    %c0_i32 = arith.constant 0 : i32
    %c0_i32_0 = arith.constant 0 : i32
    return %arg0, %c0_i32 : i32, i32
  }
  func.func @transform_1(%arg0: i32) -> (i32, i32) {
    %c0_i32 = arith.constant 0 : i32
    %c0_i32_0 = arith.constant 0 : i32
    %c0_i32_1 = arith.constant 0 : i32
    return %c0_i32, %c0_i32_0 : i32, i32
  }
  func.func @transform_2(%arg0: i32) -> (i32, i32) {
    %c0_i32 = arith.constant 0 : i32
    %c0_i32_0 = arith.constant 0 : i32
    %c0_i32_1 = arith.constant 0 : i32
    return %c0_i32, %c0_i32_0 : i32, i32
  }
  func.func @transform_3(%arg0: i32) -> (i32, i32) {
    %c0_i32 = arith.constant 0 : i32
    %c0_i32_0 = arith.constant 0 : i32
    %c0_i32_1 = arith.constant 0 : i32
    return %c0_i32, %c0_i32_0 : i32, i32
  }
  func.func @transform_4(%arg0: i32) -> (i32, i32) {
    %c0_i32 = arith.constant 0 : i32
    %c0_i32_0 = arith.constant 0 : i32
    %c0_i32_1 = arith.constant 0 : i32
    return %c0_i32, %c0_i32_0 : i32, i32
  }
  func.func @transform_5(%arg0: i32) -> (i32, i32) {
    %c0_i32 = arith.constant 0 : i32
    %c0_i32_0 = arith.constant 0 : i32
    %c0_i32_1 = arith.constant 0 : i32
    return %c0_i32, %c0_i32_0 : i32, i32
  }
  func.func @transform_6(%arg0: i32) -> (i32, i32) {
    %c0_i32 = arith.constant 0 : i32
    %c0_i32_0 = arith.constant 0 : i32
    %c0_i32_1 = arith.constant 0 : i32
    return %c0_i32, %c0_i32_0 : i32, i32
  }
  func.func @transform_7(%arg0: i32) -> (i32, i32) {
    %c0_i32 = arith.constant 0 : i32
    %c0_i32_0 = arith.constant 0 : i32
    %c0_i32_1 = arith.constant 0 : i32
    return %c0_i32, %c0_i32_0 : i32, i32
  }
  func.func @transform_8(%arg0: i32) -> (i32, i32) {
    %c0_i32 = arith.constant 0 : i32
    %c0_i32_0 = arith.constant 0 : i32
    %c0_i32_1 = arith.constant 0 : i32
    return %c0_i32, %c0_i32_0 : i32, i32
  }
  func.func @transform_9(%arg0: i32) -> (i32, i32) {
    %c0_i32 = arith.constant 0 : i32
    %c0_i32_0 = arith.constant 0 : i32
    return %arg0, %c0_i32 : i32, i32
  }
}

</mosaic_0001>

<bundles_post_ra>
// kernel: tpu_custom_call.1
= control target key start
LH: loop header
LB: loop body
LE: loop exit
PB: predicated region body
PF: predicated region fallthrough
CT: control target
= control target key end

     0   :  { %14 = vsyncpa [#allocation3], 0  ;;  %s724_s0 = inlined_call_operand.hbm [shape: bf16[8,32], index: 0, kind: input, shape index: {}]   ;;  %s725_s1 = inlined_call_operand.hbm [shape: bf16[32,64], index: 1, kind: input, shape index: {}]   ;;  %s726_s2 = inlined_call_operand.vmem [shape: f32[1,64], index: 2, kind: input, shape index: {}]   ;;  %s727_s3 = inlined_call_operand.hbm [shape: bf16[64,64], index: 3, kind: input, shape index: {}]   ;;  %s728_s4 = inlined_call_operand.vmem [shape: f32[1,64], index: 4, kind: input, shape index: {}]   ;;  %s729_s5 = inlined_call_operand.vmem [shape: f32[1,64], index: 5, kind: input, shape index: {}]   ;;  %s730_s6 = inlined_call_operand.vmem [shape: f32[1,64], index: 6, kind: input, shape index: {}]   ;;  %s731_s7 = inlined_call_operand.hbm [shape: bf16[64,128], index: 7, kind: input, shape index: {}]   ;;  %s732_s8 = inlined_call_operand.vmem [shape: f32[1,128], index: 8, kind: input, shape index: {}]   ;;  %s733_s9 = inlined_call_operand.hbm [shape: f32[8,128], index: 9, kind: output, shape index: {}]  }
   0x1   :  { %15 = vsyncpa [#allocation6], 0 }
   0x2   :  { %16 = vsyncpa [#allocation9], 0 }
   0x3   :  { %17 = vsyncpa [#allocation4], 0  ;;  %s574_s30 = smov [#allocation5]   ;;  %s456_s13 = scalar_lea.hbm %s725_s1, 256 }
   0x4   :  { %s33_s10 = sshll.u32 %s574_s30, 4  ;;  %p457_p0 = scmp.ne.s32.totalorder %s725_s1, %s456_s13  ;;  %s34_s10 = int_to_ptr.vmem [resolvable:$true] %s33_s10 }
   0x5   :  { %p460_p1 = scmp.lt.u32.totalorder %s456_s13, %s725_s1 }
   0x7   :  { %p462_p2 = pnand %p460_p1, %p457_p0 }
   0x9   :  { %465 = shalt.err (!%p462_p2)
}
   0xa   :  { %s466_s18 = scalar_lea.vmem %s34_s10, 256  ;;  %p471_p4 = scmp.lt.s32.totalorder %s34_s10, %s34_s10 }
   0xb   :  { %p467_p3 = scmp.ne.s32.totalorder %s34_s10, %s466_s18  ;;  %p472_p5 = scmp.lt.s32.totalorder %s466_s18, %s466_s18 }
   0xd   :  { %p473_p6 = por %p472_p5, %p471_p4 }
   0xf   :  { %p474_p7 = pnand %p473_p6, %p467_p3 }
  0x11   :  { %477 = shalt.err (!%p474_p7)
}
  0x12   :  { %s575_s19 = smov 64   ;;  %s576_s20 = smov 4  }
  0x13   :  { %39 = dma.hbm_to_vmem [thread:$0]  %s725_s1, 256, %s34_s10, [#allocation6], %s575_s19, %s575_s19, %s576_s20  }
  0x14   :  { %s577_s23 = smov [#allocation2]   ;;  %s578_s25 = smov [#allocation7]  }
  0x15   :  { %s24_s24 = sshll.u32 %s577_s23, 4  ;;  %s47_s26 = sshll.u32 %s578_s25, 4  ;;  %s25_s24 = int_to_ptr.vmem [resolvable:$true] %s24_s24  ;;  %s48_s26 = int_to_ptr.vmem [resolvable:$true] %s47_s26 }
  0x16   :  { %s478_s29 = scalar_lea.hbm %s724_s0, 64 }
  0x17   :  { %p479_p8 = scmp.ne.s32.totalorder %s724_s0, %s478_s29  ;;  %p482_p9 = scmp.lt.u32.totalorder %s478_s29, %s724_s0 }
  0x19   :  { %p484_p10 = pnand %p482_p9, %p479_p8 }
  0x1b   :  { %487 = shalt.err (!%p484_p10)
}
  0x1c   :  { %s488_s1 = scalar_lea.vmem %s25_s24, 64  ;;  %p493_p12 = scmp.lt.s32.totalorder %s25_s24, %s25_s24 }
  0x1d   :  { %p489_p11 = scmp.ne.s32.totalorder %s25_s24, %s488_s1  ;;  %p494_p13 = scmp.lt.s32.totalorder %s488_s1, %s488_s1 }
  0x1f   :  { %p495_p0 = por %p494_p13, %p493_p12 }
  0x21   :  { %p496_p1 = pnand %p495_p0, %p489_p11 }
  0x23   :  { %499 = shalt.err (!%p496_p1)
}
  0x24   :  { %27 = dma.hbm_to_vmem [thread:$0]  %s724_s0, 64, %s25_s24, [#allocation3]  }
  0x25   :  { %s500_s17 = scalar_lea.hbm %s727_s3, 512 }
  0x26   :  { %p501_p2 = scmp.ne.s32.totalorder %s727_s3, %s500_s17  ;;  %p504_p3 = scmp.lt.u32.totalorder %s500_s17, %s727_s3 }
  0x28   :  { %p506_p4 = pnand %p504_p3, %p501_p2 }
  0x2a   :  { %509 = shalt.err (!%p506_p4)
}
  0x2b   :  { %s510_s25 = scalar_lea.vmem %s48_s26, 512  ;;  %p515_p6 = scmp.lt.s32.totalorder %s48_s26, %s48_s26 }
  0x2c   :  { %p511_p5 = scmp.ne.s32.totalorder %s48_s26, %s510_s25  ;;  %p516_p7 = scmp.lt.s32.totalorder %s510_s25, %s510_s25 }
  0x2e   :  { %p517_p8 = por %p516_p7, %p515_p6 }
  0x30   :  { %p518_p9 = pnand %p517_p8, %p511_p5 }
  0x32   :  { %521 = shalt.err (!%p518_p9)
}
  0x33   :  { %53 = dma.hbm_to_vmem [thread:$0]  %s727_s3, 512, %s48_s26, [#allocation6], %s575_s19, %s575_s19, %s576_s20  }
  0x34   :  { %s579_s27 = smov [#allocation8]   ;;  %s522_s11 = scalar_lea.hbm %s731_s7, 512 }
  0x35   :  { %s65_s28 = sshll.u32 %s579_s27, 4  ;;  %p523_p10 = scmp.ne.s32.totalorder %s731_s7, %s522_s11  ;;  %s66_s28 = int_to_ptr.vmem [resolvable:$true] %s65_s28 }
  0x36   :  { %p526_p11 = scmp.lt.u32.totalorder %s522_s11, %s731_s7 }
  0x38   :  { %p528_p12 = pnand %p526_p11, %p523_p10 }
  0x3a   :  { %531 = shalt.err (!%p528_p12)
}
  0x3b   :  { %s532_s14 = scalar_lea.vmem %s66_s28, 512  ;;  %p537_p0 = scmp.lt.s32.totalorder %s66_s28, %s66_s28 }
  0x3c   :  { %p533_p13 = scmp.ne.s32.totalorder %s66_s28, %s532_s14  ;;  %p538_p1 = scmp.lt.s32.totalorder %s532_s14, %s532_s14 }
  0x3e   :  { %p539_p2 = por %p538_p1, %p537_p0 }
  0x40   :  { %p540_p3 = pnand %p539_p2, %p533_p13 }
  0x42   :  { %543 = shalt.err (!%p540_p3)
}
  0x43   :  { %71 = dma.hbm_to_vmem [thread:$0]  %s731_s7, 512, %s66_s28, [#allocation9], %s575_s19, %s575_s19, %s576_s20  }
  0x44   :  { %566 = dma.done.wait [#allocation3], 64  }
  0x45   :  { %567 = vsyncadd [#allocation3], 4294967232 }
  0x46   :  { %568 = dma.done.wait [#allocation6], 768  }
  0x47   :  { %569 = vsyncadd [#allocation6], 4294966528 }
  0x48   :  { %570 = dma.done.wait [#allocation9], 512  }
  0x49   :  { %571 = vsyncadd [#allocation9], 4294966784  ;;  %v580_v0 = vmov 0.0   ;;  %vm581_vm0 = vmmov 0   ;;  %v444_v1 = vld [vmem:[#allocation5] sm:$0xff]   ;;  %v445_v2 = vld [vmem:[#allocation5 + $0x8] sm:$0xff]  }
  0x4a   :  { %403 = vmatprep.subr.bf16.mxu0 %v580_v0  ;;  %407 = vmatprep.mubr.msk.bf16.mxu0 %vm581_vm0, %v580_v0  ;;  %v446_v3 = vld [vmem:[#allocation7] sm:$0xff]   ;;  %v87_v4 = vld [vmem:[#allocation2] sm:$0xf]  ;;  %vm111_vm1 = vcmask 261120   ;;  %v448_v6 = vld [vmem:[#allocation7 + $0x10] sm:$0xff]   ;;  %vm196_vm2 = vcmask 523264  }
  0x4b   :  { %411 = vmatprep.subr.bf16.mxu1 %v580_v0  ;;  %419 = vmatprep.mubr.msk.bf16.mxu1 %vm581_vm0, %v580_v0  ;;  %v447_v5 = vld [vmem:[#allocation7 + $0x8] sm:$0xff]   ;;  %v449_v7 = vld [vmem:[#allocation7 + $0x18] sm:$0xff]   ;;  %v450_v28 = vld [vmem:[#allocation8] sm:$0xff]   ;;  %s582_s22 = smov [#allocation10]  }
  0x4c   :  { %404 = vmatpush3.bf16.msra.mxu0 %v444_v1  ;;  %412 = vmatpush3.bf16.msra.mxu1 %v446_v3  ;;  %v372_v8 = vld [vmem:[%s726_s2] ss:$0 sm:$0xff]  ;;  %v452_v30 = vld [vmem:[#allocation8 + $0x10] sm:$0xff]   ;;  %v453_v31 = vld [vmem:[#allocation8 + $0x18] sm:$0xff]   ;;  %s361_s23 = sshll.u32 %s582_s22, 4  ;;  %s362_s23 = int_to_ptr.vmem [resolvable:$true] %s361_s23 }
  0x4d   :  { %405 = vmatprep.subr.bf16.mxu0 %v580_v0  ;;  %413 = vmatprep.subr.bf16.mxu1 %v580_v0  ;;  %v376_v16 = vld [vmem:[%s728_s4] ss:$0 sm:$0xff]  ;;  %p549_p5 = scmp.lt.s32.totalorder %s362_s23, %s362_s23 }
  0x4e   :  { %v451_v29 = vld [vmem:[#allocation8 + $0x8] sm:$0xff]  }
  0x4f   :  { %v382_v36 = vld [vmem:[%s729_s5] ss:$0 sm:$0xff]  ;;  %s544_s5 = scalar_lea.vmem %s362_s23, 128 }
  0x50   :  { %406 = vmatpush3.bf16.msra.mxu0 %v445_v2  ;;  %414 = vmatpush3.bf16.msra.mxu1 %v447_v5  ;;  %v383_v38 = vld [vmem:[%s730_s6] ss:$0 sm:$0xff]  ;;  %p545_p4 = scmp.ne.s32.totalorder %s362_s23, %s544_s5  ;;  %p550_p6 = scmp.lt.s32.totalorder %s544_s5, %s544_s5 }
  0x51   :  { %423 = vmatprep.subr.bf16.mxu0 %v580_v0  ;;  %415 = vmatprep.subr.bf16.mxu1 %v580_v0  ;;  %v384_v43 = vld [vmem:[%s732_s8] ss:$0 sm:$0xff] }
  0x52   :  { %p551_p7 = por %p550_p6, %p549_p5 }
  0x53   :  { %408 = vmatmul.mubr.msk.bf16.vlgmr.msra.gmra.mrb[0].mxu0 %vm111_vm1, %v87_v4 }
  0x54   :  { %431 = vmatprep.mubr.msk.bf16.mxu0 %vm581_vm0, %v580_v0  ;;  %416 = vmatpush3.bf16.msra.mxu1 %v448_v6  ;;  %p552_p8 = pnand %p551_p7, %p545_p4 }
  0x55   :  { %417 = vmatprep.subr.bf16.mxu1 %v580_v0  ;;  %424 = vmatpush3.bf16.msra.mxu0 %v450_v28 }
  0x56   :  { %425 = vmatprep.subr.bf16.mxu0 %v580_v0 }
  0x58   :  { %418 = vmatpush3.bf16.msra.mxu1 %v449_v7 }
  0x59   :  { %426 = vmatpush3.bf16.msra.mxu0 %v451_v29 }
  0x5a   :  { %427 = vmatprep.subr.bf16.mxu0 %v580_v0 }
  0x5d   :  { %428 = vmatpush3.bf16.msra.mxu0 %v452_v30 }
  0x5e   :  { %429 = vmatprep.subr.bf16.mxu0 %v580_v0 }
  0x61   :  { %430 = vmatpush3.bf16.msra.mxu0 %v453_v31 }
 0x126   :  { %v149_v9 = vpop.f32.mrb[0].mxu0 }
 0x127   :  { %v150_v10 = vadd.f32 %v372_v8, %v149_v9  ;;  %v409_v11 = vpop.f32.mrb[1].mxu0 }
 0x128   :  { %v152_v12 = vpop.f32.mrb[2].mxu0 }
 0x129   :  { %v155_v13 = vmax.f32 %v150_v10, 0.0  ;;  %v410_v14 = vpop.f32.mrb[3].mxu0 }
 0x12b   :  { %v156_v15 = vpack.c.bf16 %v155_v13, %v155_v13 }
 0x12d   :  { %420 = vmatmul.mubr.msk.bf16.vlgmr.msra.gmra.mrb[0].mxu1 %vm196_vm2, %v156_v15 }
 0x200   :  { %v234_v17 = vpop.f32.mrb[0].mxu1 }
 0x201   :  { %v235_v18 = vadd.f32 %v376_v16, %v234_v17  ;;  %v421_v19 = vpop.f32.mrb[1].mxu1 }
 0x202   :  { %v237_v20 = vpop.f32.mrb[2].mxu1 }
 0x203   :  { %v422_v21 = vpop.f32.mrb[3].mxu1  ;;  %v240_v22 = vsel %vm196_vm2, %v235_v18, 0.0 }
 0x204   :  { %241 = vadd.xlane.f32.xlu0 %v240_v22 }
 0x291   :  { %v242_v23 = vpop.xlane.xlu0 %241 }
 0x292   :  { %v244_v24 = vmul.f32 0.015625, %v242_v23 }
 0x294   :  { %v245_v25 = vsub.f32 %v235_v18, %v244_v24 }
 0x296   :  { %v246_v26 = vmul.f32 %v245_v25, %v245_v25 }
 0x298   :  { %v247_v27 = vsel %vm196_vm2, %v246_v26, 0.0 }
 0x299   :  { %248 = vadd.xlane.f32.xlu0 %v247_v27 }
 0x326   :  { %v249_v32 = vpop.xlane.xlu0 %248 }
 0x327   :  { %v250_v33 = vmul.f32 0.015625, %v249_v32 }
 0x329   :  { %v251_v34 = vadd.f32 1e-05, %v250_v33 }
 0x32b   :  { %454 = vrsqrt.f32 %v251_v34 }
 0x335   :  { %v455_v35 = vpop.eup %454 }
 0x336   :  { %v253_v37 = vmul.f32 %v455_v35, %v245_v25 }
 0x338   :  { %v261_v39 = vmul.f32 %v382_v36, %v253_v37 }
 0x33a   :  { %v269_v40 = vadd.f32 %v383_v38, %v261_v39 }
 0x33c   :  { %v270_v41 = vmax.f32 %v269_v40, 0.0 }
 0x33e   :  { %v271_v42 = vpack.c.bf16 %v270_v41, %v270_v41 }
 0x340   :  { %432 = vmatmul.mubr.msk.bf16.vlgmr.msra.gmra.mrb[4].mxu0 %vm196_vm2, %v271_v42 }
 0x413   :  { %v348_v44 = vpop.f32.mrb[4].mxu0 }
 0x414   :  { %v349_v45 = vadd.f32 %v384_v43, %v348_v44  ;;  %v433_v46 = vpop.f32.mrb[5].mxu0 }
 0x415   :  { %v351_v47 = vpop.f32.mrb[6].mxu0 }
 0x416   :  { %354 = vst [vmem:[#allocation10] sm:$0xff] %v349_v45  ;;  %v434_v48 = vpop.f32.mrb[7].mxu0 }
 0x417   :  { %555 = shalt.err (!%p552_p8)
}
 0x418   :  { %s556_s8 = scalar_lea.hbm %s733_s9, 128 }
 0x419   :  { %p557_p9 = scmp.ne.s32.totalorder %s733_s9, %s556_s8  ;;  %p560_p10 = scmp.lt.u32.totalorder %s556_s8, %s733_s9 }
 0x41b   :  { %p562_p11 = pnand %p560_p10, %p557_p9 }
 0x41d   :  { %565 = shalt.err (!%p562_p11)
}
 0x41e   :  { %364 = dma.vmem_to_hbm [thread:$0]  %s362_s23, 128, %s733_s9, [#allocation4]  }
 0x41f   :  { %572 = dma.done.wait [#allocation4], 128  }
 0x420   :  { %573 = vsyncadd [#allocation4], 4294967168 }
 0x421   :  { %368 = vsyncpa [#allocation3], 1 }
 0x422   :  { %369 = vsyncpa [#allocation6], 1 }
 0x423   :  { %370 = vsyncpa [#allocation9], 1 }
 0x424   :  { %371 = vsyncpa [#allocation4], 1 }

</bundles_post_ra>
